<compile_context>
chip_gen: v5e
topology: v5e:2x2
jax: 0.10.0
libtpu: 0.0.40
codegen_flags: <defaults>
</compile_context>

<pallas_src>
import jax
import jax.numpy as jnp
from jax.experimental import pallas as pl
from jax.experimental.pallas import tpu as pltpu


def _round_up(x, m):
    return (x + m - 1) // m * m


# ----------------------------------------------------------------------------
# Pallas kernels
# ----------------------------------------------------------------------------
def _conv_gemm_kernel(p_ref, w_ref, b_ref, o_ref):
    """Conv-as-GEMM hot path.

    p_ref: (K, Mb)  im2col patches (K = KH*KW*C contraction, M on lanes)
    w_ref: (O, K)   folded weight matrix (resident)
    b_ref: (O, 1)   bias (broadcast over lanes)
    o_ref: (O, Mb)  lane-dense output block
    """
    o_ref[...] = (jnp.dot(w_ref[...], p_ref[...],
                          preferred_element_type=jnp.float32)
                  + b_ref[...]).astype(o_ref.dtype)


def _conv_gemm_add_kernel(p_ref, w_ref, b_ref, r_ref, o_ref):
    """Conv-as-GEMM with the residual add fused into the epilogue."""
    o_ref[...] = (jnp.dot(w_ref[...], p_ref[...],
                          preferred_element_type=jnp.float32)
                  + b_ref[...] + r_ref[...]).astype(o_ref.dtype)


# ----------------------------------------------------------------------------
# Conv wrapper
# ----------------------------------------------------------------------------
def conv2d_gemm_pallas(x_nhwc, w_oihw, bias, stride, padding, residual=None):
    """2D conv (cross-correlation, PyTorch semantics) as a lane-dense GEMM.

    x_nhwc:   (N, H, W, C) float32
    w_oihw:   (O, C, KH, KW) float32  (PyTorch nn.Conv2d weight layout)
    bias:     (O,)
    residual: optional (O, N*Ho*Wo) added inside the kernel epilogue.
    Returns (out of shape (O, N*Ho*Wo) with M ordered (n, oh, ow), Ho, Wo).
    """
    N, H, W, C = x_nhwc.shape
    O, Ci, KH, KW = w_oihw.shape
    assert Ci == C
    sh, sw = stride
    ph, pw = padding

    xp = jnp.pad(x_nhwc, ((0, 0), (ph, ph), (pw, pw), (0, 0)))
    Hp, Wp = H + 2 * ph, W + 2 * pw
    Ho = (Hp - KH) // sh + 1
    Wo = (Wp - KW) // sw + 1
    M = N * Ho * Wo
    K = KH * KW * C

    # im2col built directly on the strided output grid, laid out (K, M) so the
    # big M dimension is the lane axis of every Pallas block.
    # TODO(synk): the patch matrix is still materialized by XLA before the
    # kernel; an in-kernel halo/im2col would remove the KH*KW-fold HBM
    # expansion entirely.
    cols = []
    for kh in range(KH):
        for kw in range(KW):
            cols.append(xp[:,
                           kh:kh + (Ho - 1) * sh + 1:sh,
                           kw:kw + (Wo - 1) * sw + 1:sw,
                           :])                                   # (N, Ho, Wo, C)
    pat = jnp.stack(cols, axis=0)                                # (KH*KW, N, Ho, Wo, C)
    pat = jnp.moveaxis(pat, -1, 1).reshape(K, M)                 # K ordered (kh, kw, c)

    w_mat = jnp.transpose(w_oihw, (0, 2, 3, 1)).reshape(O, K)    # same K ordering
    b_col = bias.reshape(O, 1)

    # Lane-dense M tiling; pad M so every grid block is full (no remainder).
    Mb = min(1024, _round_up(M, 128))
    # Keep the double-buffered patches block comfortably inside scoped VMEM.
    while Mb > 128 and K * Mb * 4 * 2 > 8 * 1024 * 1024:
        Mb //= 2
    M_pad = _round_up(M, Mb)
    if M_pad != M:
        pat = jnp.pad(pat, ((0, 0), (0, M_pad - M)))

    in_specs = [
        pl.BlockSpec((K, Mb), lambda i: (0, i)),    # patches (streamed)
        pl.BlockSpec((O, K), lambda i: (0, 0)),     # weights (resident)
        pl.BlockSpec((O, 1), lambda i: (0, 0)),     # bias (resident)
    ]
    args = [pat, w_mat, b_col]
    if residual is None:
        kernel = _conv_gemm_kernel
    else:
        r = residual
        if M_pad != M:
            r = jnp.pad(r, ((0, 0), (0, M_pad - M)))
        in_specs.append(pl.BlockSpec((O, Mb), lambda i: (0, i)))
        args.append(r)
        kernel = _conv_gemm_add_kernel

    out = pl.pallas_call(
        kernel,
        out_shape=jax.ShapeDtypeStruct((O, M_pad), jnp.float32),
        grid_spec=pltpu.PrefetchScalarGridSpec(
            num_scalar_prefetch=0,
            grid=(M_pad // Mb,),
            in_specs=in_specs,
            out_specs=pl.BlockSpec((O, Mb), lambda i: (0, i)),
        ),
        compiler_params=pltpu.CompilerParams(
            dimension_semantics=("parallel",)),
    )(*args)

    if M_pad != M:
        out = out[:, :M]
    return out, Ho, Wo


# ----------------------------------------------------------------------------
# CenterPivotConv4d module (synthetic deterministic weights)
# ----------------------------------------------------------------------------
class CenterPivotConv4d:
    def __init__(self, key, in_channels, out_channels, kernel_size, stride,
                 padding, bias=True):
        self.kernel_size = tuple(kernel_size)
        self.stride = tuple(stride)
        self.padding = tuple(padding)
        k1, k2, k3, k4 = jax.random.split(key, 4)
        # deterministic synthetic init; PyTorch nn.Conv2d layout (O, I, KH, KW)
        self.w1 = 0.1 * jax.random.normal(
            k1, (out_channels, in_channels) + self.kernel_size[:2], jnp.float32)
        self.b1 = 0.1 * jax.random.normal(k2, (out_channels,), jnp.float32)
        self.w2 = 0.1 * jax.random.normal(
            k3, (out_channels, in_channels) + self.kernel_size[2:], jnp.float32)
        self.b2 = 0.1 * jax.random.normal(k4, (out_channels,), jnp.float32)
        if not bias:
            self.b1 = jnp.zeros_like(self.b1)
            self.b2 = jnp.zeros_like(self.b2)

    def prune(self, ct):
        sh, sw = self.stride[2:]
        # equivalent to PyTorch index_select over the flattened (hb*wb) grid
        return ct[:, :, :, :, ::sh, ::sw]

    # -------------------------- Pallas forward -----------------------------
    def forward(self, x):
        bsz, inch, ha, wa, hb, wb = x.shape
        outch = self.w1.shape[0]
        sh34, sw34 = self.stride[2:]

        # branch 1: conv over (ha, wa), batched over (bsz, hb', wb')
        x1 = self.prune(x) if sw34 > 1 else x
        hb1, wb1 = x1.shape[4], x1.shape[5]
        x1n = jnp.transpose(x1, (0, 4, 5, 2, 3, 1)).reshape(
            bsz * hb1 * wb1, ha, wa, inch)
        g1, o_ha, o_wa = conv2d_gemm_pallas(
            x1n, self.w1, self.b1, self.stride[:2], self.padding[:2])
        # g1: (outch, M1), M1 ordered (b, hb1, wb1, o_ha, o_wa)

        # branch 2: conv over (hb, wb), batched over (bsz, ha, wa)
        x2n = jnp.transpose(x, (0, 2, 3, 4, 5, 1)).reshape(
            bsz * ha * wa, hb, wb, inch)
        kh2, kw2 = self.kernel_size[2:]
        ph2, pw2 = self.padding[2:]
        o_hb = (hb + 2 * ph2 - kh2) // sh34 + 1
        o_wb = (wb + 2 * pw2 - kw2) // sw34 + 1

        out1_shape = (bsz, outch, o_ha, o_wa, hb1, wb1)
        out2_shape = (bsz, outch, ha, wa, o_hb, o_wb)

        if out1_shape == out2_shape:
            # fused path: rearrange out1 into conv2's (O, M2) GEMM ordering and
            # add it inside the conv2 kernel epilogue (no separate add kernel).
            res = g1.reshape(outch, bsz, hb1, wb1, o_ha, o_wa)
            res = jnp.transpose(res, (0, 1, 4, 5, 2, 3)).reshape(
                outch, bsz * ha * wa * o_hb * o_wb)
            g2, _, _ = conv2d_gemm_pallas(
                x2n, self.w2, self.b2, self.stride[2:], self.padding[2:],
                residual=res)
            y = g2.reshape(outch, bsz, ha, wa, o_hb, o_wb)
            return jnp.transpose(y, (1, 0, 2, 3, 4, 5))

        # non-fused paths (output shapes differ)
        g2, _, _ = conv2d_gemm_pallas(
            x2n, self.w2, self.b2, self.stride[2:], self.padding[2:])
        out1 = jnp.transpose(
            g1.reshape(outch, bsz, hb1, wb1, o_ha, o_wa), (1, 0, 4, 5, 2, 3))
        out2 = jnp.transpose(
            g2.reshape(outch, bsz, ha, wa, o_hb, o_wb), (1, 0, 2, 3, 4, 5))
        if out1.shape[-2:] != out2.shape[-2:] and self.padding[-2:] == (0, 0):
            # TODO(synk): rare shape-collapse fallback kept in plain JAX
            # (not exercised by the configurations below).
            out1 = out1.reshape(bsz, outch, o_ha, o_wa, -1).sum(-1)
            out2 = jnp.squeeze(out2)
        return out1 + out2

    # ----------------------- plain-JAX reference ---------------------------
    def forward_ref(self, x):
        def conv2d_ref(xn, w, b, stride, padding):
            out = jax.lax.conv_general_dilated(
                xn, w, window_strides=stride,
                padding=[(padding[0], padding[0]), (padding[1], padding[1])],
                dimension_numbers=("NHWC", "OIHW", "NHWC"))
            return out + b[None, None, None, :]

        sh34, sw34 = self.stride[2:]
        out1 = self.prune(x) if sw34 > 1 else x
        bsz, inch, ha, wa, hb, wb = out1.shape
        x1 = jnp.transpose(out1, (0, 4, 5, 2, 3, 1)).reshape(
            bsz * hb * wb, ha, wa, inch)
        y1 = conv2d_ref(x1, self.w1, self.b1, self.stride[:2], self.padding[:2])
        o_ha, o_wa, outch = y1.shape[1], y1.shape[2], y1.shape[3]
        out1 = jnp.transpose(
            y1.reshape(bsz, hb, wb, o_ha, o_wa, outch), (0, 5, 3, 4, 1, 2))

        bsz, inch, ha, wa, hb, wb = x.shape
        x2 = jnp.transpose(x, (0, 2, 3, 4, 5, 1)).reshape(
            bsz * ha * wa, hb, wb, inch)
        y2 = conv2d_ref(x2, self.w2, self.b2, self.stride[2:], self.padding[2:])
        o_hb, o_wb = y2.shape[1], y2.shape[2]
        out2 = jnp.transpose(
            y2.reshape(bsz, ha, wa, o_hb, o_wb, outch), (0, 5, 1, 2, 3, 4))

        if out1.shape[-2:] != out2.shape[-2:] and self.padding[-2:] == (0, 0):
            out1 = out1.reshape(bsz, outch, o_ha, o_wa, -1).sum(-1)
            out2 = jnp.squeeze(out2)
        return out1 + out2


# ----------------------------------------------------------------------------
if __name__ == "__main__":
    key = jax.random.PRNGKey(0)
    kx, kp1, kp2 = jax.random.split(key, 3)

    bsz, inch, outch = 2, 4, 4
    ha = wa = hb = wb = 8
    x = jax.random.normal(kx, (bsz, inch, ha, wa, hb, wb), jnp.float32)

    # config 1: stride 1 everywhere (fused residual-add path)
    mod1 = CenterPivotConv4d(kp1, inch, outch,
                             kernel_size=(3, 3, 3, 3), stride=(1, 1, 1, 1),
                             padding=(1, 1, 1, 1), bias=True)
    y1 = jax.block_until_ready(jax.jit(mod1.forward)(x))
    y1_ref = mod1.forward_ref(x)
    assert y1.shape == (bsz, outch, ha, wa, hb, wb), y1.shape
    assert jnp.allclose(y1, y1_ref, atol=1e-4, rtol=1e-4), \
        float(jnp.max(jnp.abs(y1 - y1_ref)))

    # config 2: stride 2 over (hb, wb): prune + strided conv2, still fused
    mod2 = CenterPivotConv4d(kp2, inch, outch,
                             kernel_size=(3, 3, 3, 3), stride=(1, 1, 2, 2),
                             padding=(1, 1, 1, 1), bias=True)
    y2 = jax.block_until_ready(jax.jit(mod2.forward)(x))
    y2_ref = mod2.forward_ref(x)
    assert y2.shape == (bsz, outch, ha, wa, hb // 2, wb // 2), y2.shape
    assert jnp.allclose(y2, y2_ref, atol=1e-4, rtol=1e-4), \
        float(jnp.max(jnp.abs(y2 - y2_ref)))

    print("KERNEL_OK")
</pallas_src>

<mosaic_0001>
module attributes {stable_mosaic.version = 11 : i64} {
  func.func @_conv_gemm_kernel(%arg0: i32, %arg1: memref<36x1024xf32, #tpu.memory_space<vmem>>, %arg2: memref<4x36xf32, #tpu.memory_space<vmem>>, %arg3: memref<4x1xf32, #tpu.memory_space<vmem>>, %arg4: memref<4x1024xf32, #tpu.memory_space<vmem>>) attributes {dimension_semantics = [#tpu.dimension_semantics<parallel>], iteration_bounds = array<i64: 8>, scalar_prefetch = 0 : i64, scratch_operands = 0 : i64, tpu.core_type = #tpu.core_type<tc>, window_params = [{transform_indices = @transform_0, window_bounds = array<i64: 36, 1024>}, {pipeline_mode = #tpu.pipeline_mode<synchronous>, transform_indices = @transform_1, window_bounds = array<i64: 4, 36>}, {pipeline_mode = #tpu.pipeline_mode<synchronous>, transform_indices = @transform_2, window_bounds = array<i64: 4, 1>}, {transform_indices = @transform_3, window_bounds = array<i64: 4, 1024>}]} {
    %c0 = arith.constant 0 : index
    %c0_0 = arith.constant 0 : index
    %0 = vector.load %arg2[%c0, %c0_0] : memref<4x36xf32, #tpu.memory_space<vmem>>, vector<4x36xf32>
    %c0_1 = arith.constant 0 : index
    %c0_2 = arith.constant 0 : index
    %1 = vector.load %arg1[%c0_1, %c0_2] : memref<36x1024xf32, #tpu.memory_space<vmem>>, vector<36x1024xf32>
    %cst = arith.constant dense<0.000000e+00> : vector<4x1024xf32>
    %2 = tpu.matmul %0, %1, %cst {dimension_numbers = #tpu.dot_dimension_numbers<[1], [0], [0], [1], [0, 0, 1, 1], [], []>} : vector<4x36xf32>, vector<36x1024xf32>, vector<4x1024xf32> -> vector<4x1024xf32>
    %c0_3 = arith.constant 0 : index
    %c0_4 = arith.constant 0 : index
    %3 = vector.load %arg3[%c0_3, %c0_4] : memref<4x1xf32, #tpu.memory_space<vmem>>, vector<4x1xf32>
    %4 = vector.broadcast %3 : vector<4x1xf32> to vector<4x1024xf32>
    %5 = arith.addf %2, %4 : vector<4x1024xf32>
    %c0_5 = arith.constant 0 : index
    %c0_6 = arith.constant 0 : index
    %6 = vector.load %arg4[%c0_5, %c0_6] : memref<4x1024xf32, #tpu.memory_space<vmem>>, vector<4x1024xf32>
    tpu.vector_store %arg4[%c0_5, %c0_6], %5 {strides = array<i32>} : memref<4x1024xf32, #tpu.memory_space<vmem>>, vector<4x1024xf32>,
    return
  }
  func.func @transform_0(%arg0: i32) -> (i32, i32) {
    %c0_i32 = arith.constant 0 : i32
    %c0_i32_0 = arith.constant 0 : i32
    return %c0_i32, %arg0 : i32, i32
  }
  func.func @transform_1(%arg0: i32) -> (i32, i32) {
    %c0_i32 = arith.constant 0 : i32
    %c0_i32_0 = arith.constant 0 : i32
    %c0_i32_1 = arith.constant 0 : i32
    return %c0_i32, %c0_i32_0 : i32, i32
  }
  func.func @transform_2(%arg0: i32) -> (i32, i32) {
    %c0_i32 = arith.constant 0 : i32
    %c0_i32_0 = arith.constant 0 : i32
    %c0_i32_1 = arith.constant 0 : i32
    return %c0_i32, %c0_i32_0 : i32, i32
  }
  func.func @transform_3(%arg0: i32) -> (i32, i32) {
    %c0_i32 = arith.constant 0 : i32
    %c0_i32_0 = arith.constant 0 : i32
    return %c0_i32, %arg0 : i32, i32
  }
}

module attributes {stable_mosaic.version = 11 : i64} {
  func.func @_conv_gemm_add_kernel(%arg0: i32, %arg1: memref<36x1024xf32, #tpu.memory_space<vmem>>, %arg2: memref<4x36xf32, #tpu.memory_space<vmem>>, %arg3: memref<4x1xf32, #tpu.memory_space<vmem>>, %arg4: memref<4x1024xf32, #tpu.memory_space<vmem>>, %arg5: memref<4x1024xf32, #tpu.memory_space<vmem>>) attributes {dimension_semantics = [#tpu.dimension_semantics<parallel>], iteration_bounds = array<i64: 8>, scalar_prefetch = 0 : i64, scratch_operands = 0 : i64, tpu.core_type = #tpu.core_type<tc>, window_params = [{transform_indices = @transform_0, window_bounds = array<i64: 36, 1024>}, {pipeline_mode = #tpu.pipeline_mode<synchronous>, transform_indices = @transform_1, window_bounds = array<i64: 4, 36>}, {pipeline_mode = #tpu.pipeline_mode<synchronous>, transform_indices = @transform_2, window_bounds = array<i64: 4, 1>}, {transform_indices = @transform_3, window_bounds = array<i64: 4, 1024>}, {transform_indices = @transform_4, window_bounds = array<i64: 4, 1024>}]} {
    %c0 = arith.constant 0 : index
    %c0_0 = arith.constant 0 : index
    %0 = vector.load %arg2[%c0, %c0_0] : memref<4x36xf32, #tpu.memory_space<vmem>>, vector<4x36xf32>
    %c0_1 = arith.constant 0 : index
    %c0_2 = arith.constant 0 : index
    %1 = vector.load %arg1[%c0_1, %c0_2] : memref<36x1024xf32, #tpu.memory_space<vmem>>, vector<36x1024xf32>
    %cst = arith.constant dense<0.000000e+00> : vector<4x1024xf32>
    %2 = tpu.matmul %0, %1, %cst {dimension_numbers = #tpu.dot_dimension_numbers<[1], [0], [0], [1], [0, 0, 1, 1], [], []>} : vector<4x36xf32>, vector<36x1024xf32>, vector<4x1024xf32> -> vector<4x1024xf32>
    %c0_3 = arith.constant 0 : index
    %c0_4 = arith.constant 0 : index
    %3 = vector.load %arg3[%c0_3, %c0_4] : memref<4x1xf32, #tpu.memory_space<vmem>>, vector<4x1xf32>
    %4 = vector.broadcast %3 : vector<4x1xf32> to vector<4x1024xf32>
    %5 = arith.addf %2, %4 : vector<4x1024xf32>
    %c0_5 = arith.constant 0 : index
    %c0_6 = arith.constant 0 : index
    %6 = vector.load %arg4[%c0_5, %c0_6] : memref<4x1024xf32, #tpu.memory_space<vmem>>, vector<4x1024xf32>
    %7 = arith.addf %5, %6 : vector<4x1024xf32>
    %c0_7 = arith.constant 0 : index
    %c0_8 = arith.constant 0 : index
    %8 = vector.load %arg5[%c0_7, %c0_8] : memref<4x1024xf32, #tpu.memory_space<vmem>>, vector<4x1024xf32>
    tpu.vector_store %arg5[%c0_7, %c0_8], %7 {strides = array<i32>} : memref<4x1024xf32, #tpu.memory_space<vmem>>, vector<4x1024xf32>,
    return
  }
  func.func @transform_0(%arg0: i32) -> (i32, i32) {
    %c0_i32 = arith.constant 0 : i32
    %c0_i32_0 = arith.constant 0 : i32
    return %c0_i32, %arg0 : i32, i32
  }
  func.func @transform_1(%arg0: i32) -> (i32, i32) {
    %c0_i32 = arith.constant 0 : i32
    %c0_i32_0 = arith.constant 0 : i32
    %c0_i32_1 = arith.constant 0 : i32
    return %c0_i32, %c0_i32_0 : i32, i32
  }
  func.func @transform_2(%arg0: i32) -> (i32, i32) {
    %c0_i32 = arith.constant 0 : i32
    %c0_i32_0 = arith.constant 0 : i32
    %c0_i32_1 = arith.constant 0 : i32
    return %c0_i32, %c0_i32_0 : i32, i32
  }
  func.func @transform_3(%arg0: i32) -> (i32, i32) {
    %c0_i32 = arith.constant 0 : i32
    %c0_i32_0 = arith.constant 0 : i32
    return %c0_i32, %arg0 : i32, i32
  }
  func.func @transform_4(%arg0: i32) -> (i32, i32) {
    %c0_i32 = arith.constant 0 : i32
    %c0_i32_0 = arith.constant 0 : i32
    return %c0_i32, %arg0 : i32, i32
  }
}

</mosaic_0001>

<bundles_post_ra>
// kernel: forward.2
= control target key start
LH: loop header
LB: loop body
LE: loop exit
PB: predicated region body
PF: predicated region fallthrough
CT: control target
= control target key end

     0   :  { %s694_s12 = smov 0   ;;  %s696_s13 = smov 0   ;;  %s898_s0 = inlined_call_operand.vmem [shape: f32[36,8192], index: 0, kind: input, shape index: {}]   ;;  %s899_s1 = inlined_call_operand.vmem [shape: f32[4,36], index: 1, kind: input, shape index: {}]   ;;  %s900_s2 = inlined_call_operand.vmem [shape: f32[4,1], index: 2, kind: input, shape index: {}]   ;;  %s901_s3 = inlined_call_operand.vmem [shape: f32[4,8192], index: 3, kind: output, shape index: {}]  }
   0x1   :  { %s698_s14 = smov 0  }
   0x2 LB: > { %s593_s15 = sadd.s32 4294967295, %s671_s14   ;;  %s711_s16 = sadd.s32 1, %s671_s14   ;;  %s671_s14 = sphi %s698_s14, %s904_s14   ;;  %s667_s13 = sphi %s696_s13, %s903_s13   ;;  %s663_s12 = sphi %s694_s12, %s902_s12  }
   0x3   : > { %s17_s17 = ssub.s32 %s671_s14, %s711_s16  ;;  %s20_s18 = sadd.s32 1, %s667_s13 }
   0x4   : > { %p18_p0 = scmp.eq.s32.totalorder %s17_s17, 0  ;;  %p27_p1 = scmp.ne.s32.totalorder %s667_s13, %s663_s12 }
   0x5   : > { %p28_p2 = scmp.eq.s32.totalorder %s671_s14, 0  ;;  %p596_p4 = scmp.ge.s32.totalorder %s671_s14, 8 }
   0x6   : > { %s720_s19 = scalar_select %p18_p0, %s667_s13, %s20_s18  }
   0x7   : > { %p29_p3 = por %p28_p2, %p27_p1  ;;  %127 = sbr.rel (%p596_p4) target bundleno = 56 (0x38), region = 24 }
   0xc   : > { %130 = sbr.rel (!%p29_p3) target bundleno = 56 (0x38), region = 28  ;;  %s132_s20 = sand.u32 (%p29_p3), 1, %s667_s13  }
   0xd   : > { %s620_s21 = sshll.u32 (%p29_p3), %s671_s14, 6  ;;  %s621_s22 = smul.u32 (%p29_p3), 320, %s132_s20 }
   0xe   : > { %s728_s25 = scalar_lea.vmem (%p29_p3), %s898_s0, %s620_s21 }
   0xf   : > { %v150_v0 = vld [vmem:[%s728_s25] sm:$0xff] (%p29_p3)  ;;  %v152_v1 = vld [vmem:[%s728_s25 + $0x8] sm:$0xff] (%p29_p3)  ;;  %v154_v2 = vld [vmem:[%s728_s25 + $0x10] sm:$0xff] (%p29_p3)  ;;  %s733_s26 = scalar_lea.vmem (%p29_p3), [#allocation2], %s621_s22 }
  0x10   : > { %151 = vst [vmem:[%s733_s26] sm:$0xff] (%p29_p3), %v150_v0  ;;  %v156_v3 = vld [vmem:[%s728_s25 + $0x18] sm:$0xff] (%p29_p3)  ;;  %v158_v4 = vld [vmem:[%s728_s25 + $0x20] sm:$0xff] (%p29_p3)  ;;  %v160_v5 = vld [vmem:[%s728_s25 + $0x28] sm:$0xff] (%p29_p3) }
  0x11   : > { %153 = vst [vmem:[%s733_s26 + $0x8] sm:$0xff] %v152_v1  ;;  %v162_v6 = vld [vmem:[%s728_s25 + $0x30] sm:$0xff]  ;;  %v164_v7 = vld [vmem:[%s728_s25 + $0x38] sm:$0xff]  ;;  %v166_v8 = vld [vmem:[%s728_s25 + $0x200] sm:$0xff] }
  0x12   : > { %155 = vst [vmem:[%s733_s26 + $0x10] sm:$0xff] %v154_v2  ;;  %v168_v9 = vld [vmem:[%s728_s25 + $0x208] sm:$0xff]  ;;  %v170_v10 = vld [vmem:[%s728_s25 + $0x210] sm:$0xff]  ;;  %v172_v11 = vld [vmem:[%s728_s25 + $0x218] sm:$0xff] }
  0x13   : > { %157 = vst [vmem:[%s733_s26 + $0x18] sm:$0xff] %v156_v3  ;;  %v174_v12 = vld [vmem:[%s728_s25 + $0x220] sm:$0xff]  ;;  %v176_v13 = vld [vmem:[%s728_s25 + $0x228] sm:$0xff]  ;;  %v178_v14 = vld [vmem:[%s728_s25 + $0x230] sm:$0xff] }
  0x14   : > { %159 = vst [vmem:[%s733_s26 + $0x20] sm:$0xff] %v158_v4  ;;  %v180_v15 = vld [vmem:[%s728_s25 + $0x238] sm:$0xff]  ;;  %v182_v16 = vld [vmem:[%s728_s25 + $0x400] sm:$0xff]  ;;  %v184_v17 = vld [vmem:[%s728_s25 + $0x408] sm:$0xff] }
  0x15   : > { %161 = vst [vmem:[%s733_s26 + $0x28] sm:$0xff] %v160_v5  ;;  %v186_v18 = vld [vmem:[%s728_s25 + $0x410] sm:$0xff]  ;;  %v188_v19 = vld [vmem:[%s728_s25 + $0x418] sm:$0xff]  ;;  %v190_v20 = vld [vmem:[%s728_s25 + $0x420] sm:$0xff] }
  0x16   : > { %163 = vst [vmem:[%s733_s26 + $0x30] sm:$0xff] %v162_v6  ;;  %v192_v21 = vld [vmem:[%s728_s25 + $0x428] sm:$0xff]  ;;  %v194_v22 = vld [vmem:[%s728_s25 + $0x430] sm:$0xff]  ;;  %v196_v23 = vld [vmem:[%s728_s25 + $0x438] sm:$0xff] }
  0x17   : > { %165 = vst [vmem:[%s733_s26 + $0x38] sm:$0xff] %v164_v7  ;;  %v198_v24 = vld [vmem:[%s728_s25 + $0x600] sm:$0xff]  ;;  %v200_v25 = vld [vmem:[%s728_s25 + $0x608] sm:$0xff]  ;;  %v202_v26 = vld [vmem:[%s728_s25 + $0x610] sm:$0xff] }
  0x18   : > { %167 = vst [vmem:[%s733_s26 + $0x40] sm:$0xff] %v166_v8  ;;  %v204_v27 = vld [vmem:[%s728_s25 + $0x618] sm:$0xff]  ;;  %v206_v28 = vld [vmem:[%s728_s25 + $0x620] sm:$0xff]  ;;  %v208_v29 = vld [vmem:[%s728_s25 + $0x628] sm:$0xff] }
  0x19   : > { %169 = vst [vmem:[%s733_s26 + $0x48] sm:$0xff] %v168_v9  ;;  %v210_v30 = vld [vmem:[%s728_s25 + $0x630] sm:$0xff]  ;;  %v212_v31 = vld [vmem:[%s728_s25 + $0x638] sm:$0xff]  ;;  %v214_v32 = vld [vmem:[%s728_s25 + $0x800] sm:$0xff] }
  0x1a   : > { %171 = vst [vmem:[%s733_s26 + $0x50] sm:$0xff] %v170_v10  ;;  %v216_v33 = vld [vmem:[%s728_s25 + $0x808] sm:$0xff]  ;;  %v218_v34 = vld [vmem:[%s728_s25 + $0x810] sm:$0xff]  ;;  %v220_v35 = vld [vmem:[%s728_s25 + $0x818] sm:$0xff] }
  0x1b   : > { %173 = vst [vmem:[%s733_s26 + $0x58] sm:$0xff] %v172_v11  ;;  %v222_v36 = vld [vmem:[%s728_s25 + $0x820] sm:$0xff]  ;;  %v224_v37 = vld [vmem:[%s728_s25 + $0x828] sm:$0xff]  ;;  %v226_v38 = vld [vmem:[%s728_s25 + $0x830] sm:$0xff] }
  0x1c   : > { %175 = vst [vmem:[%s733_s26 + $0x60] sm:$0xff] %v174_v12  ;;  %v228_v39 = vld [vmem:[%s728_s25 + $0x838] sm:$0xff] }
  0x1d   : > { %177 = vst [vmem:[%s733_s26 + $0x68] sm:$0xff] %v176_v13 }
  0x1e   : > { %179 = vst [vmem:[%s733_s26 + $0x70] sm:$0xff] %v178_v14 }
  0x1f   : > { %181 = vst [vmem:[%s733_s26 + $0x78] sm:$0xff] %v180_v15 }
  0x20   : > { %183 = vst [vmem:[%s733_s26 + $0x80] sm:$0xff] %v182_v16 }
  0x21   : > { %185 = vst [vmem:[%s733_s26 + $0x88] sm:$0xff] %v184_v17 }
  0x22   : > { %187 = vst [vmem:[%s733_s26 + $0x90] sm:$0xff] %v186_v18 }
  0x23   : > { %189 = vst [vmem:[%s733_s26 + $0x98] sm:$0xff] %v188_v19 }
  0x24   : > { %191 = vst [vmem:[%s733_s26 + $0xa0] sm:$0xff] %v190_v20 }
  0x25   : > { %193 = vst [vmem:[%s733_s26 + $0xa8] sm:$0xff] %v192_v21 }
  0x26   : > { %195 = vst [vmem:[%s733_s26 + $0xb0] sm:$0xff] %v194_v22 }
  0x27   : > { %197 = vst [vmem:[%s733_s26 + $0xb8] sm:$0xff] %v196_v23 }
  0x28   : > { %199 = vst [vmem:[%s733_s26 + $0xc0] sm:$0xff] %v198_v24 }
  0x29   : > { %201 = vst [vmem:[%s733_s26 + $0xc8] sm:$0xff] %v200_v25 }
  0x2a   : > { %203 = vst [vmem:[%s733_s26 + $0xd0] sm:$0xff] %v202_v26 }
  0x2b   : > { %205 = vst [vmem:[%s733_s26 + $0xd8] sm:$0xff] %v204_v27 }
  0x2c   : > { %207 = vst [vmem:[%s733_s26 + $0xe0] sm:$0xff] %v206_v28 }
  0x2d   : > { %209 = vst [vmem:[%s733_s26 + $0xe8] sm:$0xff] %v208_v29 }
  0x2e   : > { %211 = vst [vmem:[%s733_s26 + $0xf0] sm:$0xff] %v210_v30 }
  0x2f   : > { %213 = vst [vmem:[%s733_s26 + $0xf8] sm:$0xff] %v212_v31 }
  0x30   : > { %215 = vst [vmem:[%s733_s26 + $0x100] sm:$0xff] %v214_v32 }
  0x31   : > { %217 = vst [vmem:[%s733_s26 + $0x108] sm:$0xff] %v216_v33 }
  0x32   : > { %219 = vst [vmem:[%s733_s26 + $0x110] sm:$0xff] %v218_v34 }
  0x33   : > { %221 = vst [vmem:[%s733_s26 + $0x118] sm:$0xff] %v220_v35 }
  0x34   : > { %223 = vst [vmem:[%s733_s26 + $0x120] sm:$0xff] %v222_v36 }
  0x35   : > { %225 = vst [vmem:[%s733_s26 + $0x128] sm:$0xff] %v224_v37 }
  0x36   : > { %227 = vst [vmem:[%s733_s26 + $0x130] sm:$0xff] %v226_v38 }
  0x37   : > { %229 = vst [vmem:[%s733_s26 + $0x138] sm:$0xff] %v228_v39 }
  0x38 PF: > { %p599_p5 = scmp.ge.s32.totalorder %s671_s14, 1  ;;  %p234_p6 = scmp.lt.s32.totalorder %s671_s14, 9 }
  0x3a   : > { %p235_p7 = pnand %p599_p5, %p234_p6 }
  0x3b   : > { %s241_s27 = sand.u32 (!%p235_p7), 1, %s663_s12   ;;  %s600_s7 = sshll.u32 (!%p235_p7), %s593_s15, 3 }
  0x3c   : > { %238 = sbr.rel (%p235_p7) target bundleno = 225 (0xe1), region = 51  ;;  %p266_p8 = scmp.lt.s32.totalorder (!%p235_p7), %s600_s7, 63 }
  0x3d   : > { %s622_s28 = smul.u32 (!%p235_p7), 320, %s241_s27 }
  0x3f   : > { %s818_s4 = scalar_lea.vmem (!%p235_p7), [#allocation2], %s622_s28 }
  0x41   : > { %v673_v40 = vmov 0   ;;  %v312_v41 = vld [vmem:[%s900_s2] sm:$0xf]  ;;  %vm322_vm0 = vcmask 1043456   ;;  %v306_v42 = vld [vmem:[%s818_s4 + $0x110] sm:$0xf] }
  0x42   : > { %648 = vset.pattern.permute.xlu0 %v673_v40  ;;  %v307_v43 = vld [vmem:[%s818_s4 + $0x118] sm:$0xf]  ;;  %v298_v44 = vld [vmem:[%s818_s4 + $0xd0] sm:$0xff]  ;;  %606 = vmatpush.msk.msra.mxu2 %vm322_vm0, %v306_v42  ;;  %v305_v46 = vld [vmem:[%s818_s4 + $0x108] sm:$0xf]  ;;  %vm318_vm1 = vcmask 293888  }
  0x43   : > { %315 = vperm.xlu0 %648, %v312_v41   ;;  %608 = vmatpush.msk.msra.mxu3 %vm322_vm0, %v307_v43  ;;  %v299_v45 = vld [vmem:[%s818_s4 + $0xd8] sm:$0xff]  ;;  %v290_v47 = vld [vmem:[%s818_s4 + $0x90] sm:$0xff]  ;;  %v304_v49 = vld [vmem:[%s818_s4 + $0x100] sm:$0xf]  ;;  %s906_s7 = smov (!%p266_p8, %s600_s7), 63 }
  0x44   : > { %604 = vmatpush.msk.msra.mxu1 %vm322_vm0, %v305_v46  ;;  %v291_v48 = vld [vmem:[%s818_s4 + $0x98] sm:$0xff]  ;;  %v297_v50 = vld [vmem:[%s818_s4 + $0xc8] sm:$0xff]  ;;  %399 = vmatpush.msra.mxu2 %v298_v44  ;;  %v296_v51 = vld [vmem:[%s818_s4 + $0xc0] sm:$0xff]  ;;  %s601_s8 = sshll.u32 %s906_s7, 2 }
  0x45   : > { %419 = vmatpush.msra.mxu3 %v299_v45  ;;  %602 = vmatpush.msk.msra.mxu0 %vm322_vm0, %v304_v49  ;;  %v282_v52 = vld [vmem:[%s818_s4 + $0x50] sm:$0xff]  ;;  %v283_v53 = vld [vmem:[%s818_s4 + $0x58] sm:$0xff]  ;;  %v289_v54 = vld [vmem:[%s818_s4 + $0x88] sm:$0xff]  ;;  %s269_s11 = scalar_lea.vmem %s901_s3, %s601_s8 }
  0x46   : > { %379 = vmatpush.msra.mxu1 %v297_v50  ;;  %400 = vmatpush.msra.mxu2 %v290_v47  ;;  %v288_v55 = vld [vmem:[%s818_s4 + $0x80] sm:$0xff]  ;;  %v274_v56 = vld [vmem:[%s818_s4 + $0x10] sm:$0xff]  ;;  %v275_v57 = vld [vmem:[%s818_s4 + $0x18] sm:$0xff] }
  0x47   : > { %420 = vmatpush.msra.mxu3 %v291_v48  ;;  %359 = vmatpush.msra.mxu0 %v296_v51  ;;  %v281_v58 = vld [vmem:[%s818_s4 + $0x48] sm:$0xff]  ;;  %v310_v59 = vld [vmem:[%s818_s4 + $0x130] sm:$0xf]  ;;  %v311_v60 = vld [vmem:[%s818_s4 + $0x138] sm:$0xf] }
  0x48   : > { %380 = vmatpush.msra.mxu1 %v289_v54  ;;  %401 = vmatpush.msra.mxu2 %v282_v52  ;;  %v271_v61 = vld [vmem:[%s899_s1] sm:$0xf]  ;;  %v302_v62 = vld [vmem:[%s818_s4 + $0xf0] sm:$0xff]  ;;  %v303_v63 = vld [vmem:[%s818_s4 + $0xf8] sm:$0xff] }
  0x49   : > { %421 = vmatpush.msra.mxu3 %v283_v53  ;;  %360 = vmatpush.msra.mxu0 %v288_v55  ;;  %v280_v0 = vld [vmem:[%s818_s4 + $0x40] sm:$0xff]  ;;  %v273_v1 = vld [vmem:[%s818_s4 + $0x8] sm:$0xff]  ;;  %v294_v3 = vld [vmem:[%s818_s4 + $0xb0] sm:$0xff] }
  0x4a   : > { %381 = vmatpush.msra.mxu1 %v281_v58  ;;  %402 = vmatpush.msra.mxu2 %v274_v56  ;;  %v309_v2 = vld [vmem:[%s818_s4 + $0x128] sm:$0xf]  ;;  %v295_v4 = vld [vmem:[%s818_s4 + $0xb8] sm:$0xff]  ;;  %v272_v5 = vld [vmem:[%s818_s4] sm:$0xff] }
  0x4b   : > { %422 = vmatpush.msra.mxu3 %v275_v57  ;;  %607 = vmatmul.msk.f32.vlgmr.msra.gmra.mxu2 %vm318_vm1, %v271_v61  ;;  %v308_v6 = vld [vmem:[%s818_s4 + $0x120] sm:$0xf]  ;;  %v301_v7 = vld [vmem:[%s818_s4 + $0xe8] sm:$0xff]  ;;  %v286_v8 = vld [vmem:[%s818_s4 + $0x70] sm:$0xff] }
  0x4c   : > { %614 = vmatpush.msk.msrb.mxu2 %vm322_vm0, %v310_v59  ;;  %609 = vmatmul.msk.f32.vlgmr.msra.gmra.mxu3 %vm318_vm1, %v271_v61  ;;  %v287_v9 = vld [vmem:[%s818_s4 + $0x78] sm:$0xff]  ;;  %v300_v10 = vld [vmem:[%s818_s4 + $0xe0] sm:$0xff]  ;;  %v293_v11 = vld [vmem:[%s818_s4 + $0xa8] sm:$0xff] }
  0x4d   : > { %616 = vmatpush.msk.msrb.mxu3 %vm322_vm0, %v311_v60  ;;  %361 = vmatpush.msra.mxu0 %v280_v0  ;;  %v278_v12 = vld [vmem:[%s818_s4 + $0x30] sm:$0xff]  ;;  %v279_v13 = vld [vmem:[%s818_s4 + $0x38] sm:$0xff]  ;;  %v292_v14 = vld [vmem:[%s818_s4 + $0xa0] sm:$0xff] }
  0x4e   : > { %479 = vmatpush.msrb.mxu2 %v302_v62  ;;  %382 = vmatpush.msra.mxu1 %v273_v1  ;;  %v285_v15 = vld [vmem:[%s818_s4 + $0x68] sm:$0xff]  ;;  %v284_v16 = vld [vmem:[%s818_s4 + $0x60] sm:$0xff] }
  0x4f   : > { %499 = vmatpush.msrb.mxu3 %v303_v63  ;;  %362 = vmatpush.msra.mxu0 %v272_v5  ;;  %v277_v17 = vld [vmem:[%s818_s4 + $0x28] sm:$0xff]  ;;  %v276_v18 = vld [vmem:[%s818_s4 + $0x20] sm:$0xff] }
  0x50   : > { %612 = vmatpush.msk.msrb.mxu1 %vm322_vm0, %v309_v2  ;;  %480 = vmatpush.msrb.mxu2 %v294_v3 }
  0x51   : > { %500 = vmatpush.msrb.mxu3 %v295_v4  ;;  %605 = vmatmul.msk.f32.vlgmr.msra.gmra.mxu1 %vm318_vm1, %v271_v61 }
  0x52   : > { %610 = vmatpush.msk.msrb.mxu0 %vm322_vm0, %v308_v6  ;;  %459 = vmatpush.msrb.mxu1 %v301_v7 }
  0x53   : > { %481 = vmatpush.msrb.mxu2 %v286_v8  ;;  %501 = vmatpush.msrb.mxu3 %v287_v9 }
  0x54   : > { %603 = vmatmul.msk.f32.vlgmr.msra.gmra.mxu0 %vm318_vm1, %v271_v61  ;;  %460 = vmatpush.msrb.mxu1 %v293_v11 }
  0x55   : > { %439 = vmatpush.msrb.mxu0 %v300_v10  ;;  %482 = vmatpush.msrb.mxu2 %v278_v12 }
  0x56   : > { %502 = vmatpush.msrb.mxu3 %v279_v13  ;;  %615 = vmatmul.msk.f32.vlgmr.msrb.gmra.mxu2 %vm318_vm1, %v271_v61 }
  0x57   : > { %617 = vmatmul.msk.f32.vlgmr.msrb.gmra.mxu3 %vm318_vm1, %v271_v61  ;;  %440 = vmatpush.msrb.mxu0 %v292_v14 }
  0x58   : > { %461 = vmatpush.msrb.mxu1 %v285_v15 }
  0x59   : > { %441 = vmatpush.msrb.mxu0 %v284_v16 }
  0x5a   : > { %462 = vmatpush.msrb.mxu1 %v277_v17 }
  0x5b   : > { %613 = vmatmul.msk.f32.vlgmr.msrb.gmra.mxu1 %vm318_vm1, %v271_v61  ;;  %442 = vmatpush.msrb.mxu0 %v276_v18 }
  0x5c   : > { %611 = vmatmul.msk.f32.vlgmr.msrb.gmra.mxu0 %vm318_vm1, %v271_v61 }
  0xb5   : > { %v316_v19 = vpop.permute.xlu0 %315 }
  0xce   : > { %v384_v20 = vpop.f32.mrf.mxu1  ;;  %v404_v22 = vpop.f32.mrf.mxu2 }
  0xcf   : > { %v385_v21 = vadd.f32 %v384_v20, %v316_v19  ;;  %v424_v23 = vpop.f32.mrf.mxu3  ;;  %v405_v25 = vadd.f32 %v404_v22, %v316_v19 }
  0xd0   : > { %v425_v26 = vadd.f32 %v424_v23, %v316_v19 }
  0xd1   : > { %v364_v24 = vpop.f32.mrf.mxu0  ;;  %v515_v28 = vrot.slane %v385_v21, 4 }
  0xd2   : > { %v365_v27 = vadd.f32 %v364_v24, %v316_v19  ;;  %v516_v29 = vrot.slane %v425_v26, 4 }
  0xd4   : > { %v519_v30 = vsel %vm322_vm0, %v365_v27, %v515_v28  ;;  %v520_v31 = vsel %vm322_vm0, %v405_v25, %v516_v29 }
  0xd5   : > { %527 = vst [vmem:[%s269_s11] sm:$0xff] %v519_v30 }
  0xd6   : > { %528 = vst [vmem:[%s269_s11 + $0x8] sm:$0xff] %v520_v31 }
  0xd8   : > { %v464_v32 = vpop.f32.mrf.mxu1 }
  0xd9   : > { %v465_v33 = vadd.f32 %v464_v32, %v316_v19  ;;  %v444_v34 = vpop.f32.mrf.mxu0  ;;  %v484_v37 = vpop.f32.mrf.mxu2 }
  0xda   : > { %v445_v36 = vadd.f32 %v444_v34, %v316_v19  ;;  %v504_v38 = vpop.f32.mrf.mxu3  ;;  %v485_v41 = vadd.f32 %v484_v37, %v316_v19 }
  0xdb   : > { %v517_v35 = vrot.slane %v465_v33, 4  ;;  %v505_v39 = vadd.f32 %v504_v38, %v316_v19 }
  0xdd   : > { %v521_v40 = vsel %vm322_vm0, %v445_v36, %v517_v35  ;;  %v518_v42 = vrot.slane %v505_v39, 4 }
  0xde   : > { %529 = vst [vmem:[%s269_s11 + $0x10] sm:$0xff] %v521_v40 }
  0xdf   : > { %v522_v43 = vsel %vm322_vm0, %v485_v41, %v518_v42 }
  0xe0   : > { %530 = vst [vmem:[%s269_s11 + $0x18] sm:$0xff] %v522_v43 }
  0xe1 PF: > { %p10_p9 = scmp.ge.s32.totalorder %s711_s16, 10   ;;  %s902_s12 = smov %s667_s13 }
  0xe2   : > { %s903_s13 = smov %s720_s19  ;;  %s904_s14 = smov %s711_s16 }
  0xe3   :  { %12 = sbr.rel (!%p10_p9) target bundleno = 2 (0x2), region = 90 }

// kernel: forward.3
= control target key start
LH: loop header
LB: loop body
LE: loop exit
PB: predicated region body
PF: predicated region fallthrough
CT: control target
= control target key end

     0   :  { %s801_s15 = smov 0   ;;  %s803_s16 = smov 0   ;;  %s1008_s0 = inlined_call_operand.vmem [shape: f32[36,8192], index: 0, kind: input, shape index: {}]   ;;  %s1009_s1 = inlined_call_operand.vmem [shape: f32[4,36], index: 1, kind: input, shape index: {}]   ;;  %s1010_s2 = inlined_call_operand.vmem [shape: f32[4,1], index: 2, kind: input, shape index: {}]   ;;  %s1011_s3 = inlined_call_operand.vmem [shape: f32[4,8192], index: 3, kind: input, shape index: {}]   ;;  %s1012_s4 = inlined_call_operand.vmem [shape: f32[4,8192], index: 4, kind: output, shape index: {}]  }
   0x1   :  { %s805_s17 = smov 0  }
   0x2 LB: > { %s693_s18 = sadd.s32 4294967295, %s773_s17   ;;  %s818_s19 = sadd.s32 1, %s773_s17   ;;  %s773_s17 = sphi %s805_s17, %s1015_s17   ;;  %s769_s16 = sphi %s803_s16, %s1014_s16   ;;  %s765_s15 = sphi %s801_s15, %s1013_s15  }
   0x3   : > { %s18_s20 = ssub.s32 %s773_s17, %s818_s19  ;;  %s21_s21 = sadd.s32 1, %s769_s16 }
   0x4   : > { %p19_p0 = scmp.eq.s32.totalorder %s18_s20, 0  ;;  %p28_p1 = scmp.ne.s32.totalorder %s769_s16, %s765_s15 }
   0x5   : > { %p29_p2 = scmp.eq.s32.totalorder %s773_s17, 0  ;;  %p696_p4 = scmp.ge.s32.totalorder %s773_s17, 8 }
   0x6   : > { %s827_s22 = scalar_select %p19_p0, %s769_s16, %s21_s21  }
   0x7   : > { %p30_p3 = por %p29_p2, %p28_p1  ;;  %154 = sbr.rel (%p696_p4) target bundleno = 56 (0x38), region = 24 }
   0xc   : > { %157 = sbr.rel (!%p30_p3) target bundleno = 56 (0x38), region = 28  ;;  %s159_s23 = sand.u32 (%p30_p3), 1, %s769_s16  }
   0xd   : > { %s722_s24 = sshll.u32 (%p30_p3), %s773_s17, 6  ;;  %s723_s25 = smul.u32 (%p30_p3), 320, %s159_s23 }
   0xe   : > { %s835_s28 = scalar_lea.vmem (%p30_p3), %s1008_s0, %s722_s24 }
   0xf   : > { %v177_v0 = vld [vmem:[%s835_s28] sm:$0xff] (%p30_p3)  ;;  %v179_v1 = vld [vmem:[%s835_s28 + $0x8] sm:$0xff] (%p30_p3)  ;;  %v181_v2 = vld [vmem:[%s835_s28 + $0x10] sm:$0xff] (%p30_p3)  ;;  %s840_s29 = scalar_lea.vmem (%p30_p3), [#allocation2], %s723_s25 }
  0x10   : > { %178 = vst [vmem:[%s840_s29] sm:$0xff] (%p30_p3), %v177_v0  ;;  %v183_v3 = vld [vmem:[%s835_s28 + $0x18] sm:$0xff] (%p30_p3)  ;;  %v185_v4 = vld [vmem:[%s835_s28 + $0x20] sm:$0xff] (%p30_p3)  ;;  %v187_v5 = vld [vmem:[%s835_s28 + $0x28] sm:$0xff] (%p30_p3) }
  0x11   : > { %180 = vst [vmem:[%s840_s29 + $0x8] sm:$0xff] %v179_v1  ;;  %v189_v6 = vld [vmem:[%s835_s28 + $0x30] sm:$0xff]  ;;  %v191_v7 = vld [vmem:[%s835_s28 + $0x38] sm:$0xff]  ;;  %v193_v8 = vld [vmem:[%s835_s28 + $0x200] sm:$0xff] }
  0x12   : > { %182 = vst [vmem:[%s840_s29 + $0x10] sm:$0xff] %v181_v2  ;;  %v195_v9 = vld [vmem:[%s835_s28 + $0x208] sm:$0xff]  ;;  %v197_v10 = vld [vmem:[%s835_s28 + $0x210] sm:$0xff]  ;;  %v199_v11 = vld [vmem:[%s835_s28 + $0x218] sm:$0xff] }
  0x13   : > { %184 = vst [vmem:[%s840_s29 + $0x18] sm:$0xff] %v183_v3  ;;  %v201_v12 = vld [vmem:[%s835_s28 + $0x220] sm:$0xff]  ;;  %v203_v13 = vld [vmem:[%s835_s28 + $0x228] sm:$0xff]  ;;  %v205_v14 = vld [vmem:[%s835_s28 + $0x230] sm:$0xff] }
  0x14   : > { %186 = vst [vmem:[%s840_s29 + $0x20] sm:$0xff] %v185_v4  ;;  %v207_v15 = vld [vmem:[%s835_s28 + $0x238] sm:$0xff]  ;;  %v209_v16 = vld [vmem:[%s835_s28 + $0x400] sm:$0xff]  ;;  %v211_v17 = vld [vmem:[%s835_s28 + $0x408] sm:$0xff] }
  0x15   : > { %188 = vst [vmem:[%s840_s29 + $0x28] sm:$0xff] %v187_v5  ;;  %v213_v18 = vld [vmem:[%s835_s28 + $0x410] sm:$0xff]  ;;  %v215_v19 = vld [vmem:[%s835_s28 + $0x418] sm:$0xff]  ;;  %v217_v20 = vld [vmem:[%s835_s28 + $0x420] sm:$0xff] }
  0x16   : > { %190 = vst [vmem:[%s840_s29 + $0x30] sm:$0xff] %v189_v6  ;;  %v219_v21 = vld [vmem:[%s835_s28 + $0x428] sm:$0xff]  ;;  %v221_v22 = vld [vmem:[%s835_s28 + $0x430] sm:$0xff]  ;;  %v223_v23 = vld [vmem:[%s835_s28 + $0x438] sm:$0xff] }
  0x17   : > { %192 = vst [vmem:[%s840_s29 + $0x38] sm:$0xff] %v191_v7  ;;  %v225_v24 = vld [vmem:[%s835_s28 + $0x600] sm:$0xff]  ;;  %v227_v25 = vld [vmem:[%s835_s28 + $0x608] sm:$0xff]  ;;  %v229_v26 = vld [vmem:[%s835_s28 + $0x610] sm:$0xff] }
  0x18   : > { %194 = vst [vmem:[%s840_s29 + $0x40] sm:$0xff] %v193_v8  ;;  %v231_v27 = vld [vmem:[%s835_s28 + $0x618] sm:$0xff]  ;;  %v233_v28 = vld [vmem:[%s835_s28 + $0x620] sm:$0xff]  ;;  %v235_v29 = vld [vmem:[%s835_s28 + $0x628] sm:$0xff] }
  0x19   : > { %196 = vst [vmem:[%s840_s29 + $0x48] sm:$0xff] %v195_v9  ;;  %v237_v30 = vld [vmem:[%s835_s28 + $0x630] sm:$0xff]  ;;  %v239_v31 = vld [vmem:[%s835_s28 + $0x638] sm:$0xff]  ;;  %v241_v32 = vld [vmem:[%s835_s28 + $0x800] sm:$0xff] }
  0x1a   : > { %198 = vst [vmem:[%s840_s29 + $0x50] sm:$0xff] %v197_v10  ;;  %v243_v33 = vld [vmem:[%s835_s28 + $0x808] sm:$0xff]  ;;  %v245_v34 = vld [vmem:[%s835_s28 + $0x810] sm:$0xff]  ;;  %v247_v35 = vld [vmem:[%s835_s28 + $0x818] sm:$0xff] }
  0x1b   : > { %200 = vst [vmem:[%s840_s29 + $0x58] sm:$0xff] %v199_v11  ;;  %v249_v36 = vld [vmem:[%s835_s28 + $0x820] sm:$0xff]  ;;  %v251_v37 = vld [vmem:[%s835_s28 + $0x828] sm:$0xff]  ;;  %v253_v38 = vld [vmem:[%s835_s28 + $0x830] sm:$0xff] }
  0x1c   : > { %202 = vst [vmem:[%s840_s29 + $0x60] sm:$0xff] %v201_v12  ;;  %v255_v39 = vld [vmem:[%s835_s28 + $0x838] sm:$0xff] }
  0x1d   : > { %204 = vst [vmem:[%s840_s29 + $0x68] sm:$0xff] %v203_v13 }
  0x1e   : > { %206 = vst [vmem:[%s840_s29 + $0x70] sm:$0xff] %v205_v14 }
  0x1f   : > { %208 = vst [vmem:[%s840_s29 + $0x78] sm:$0xff] %v207_v15 }
  0x20   : > { %210 = vst [vmem:[%s840_s29 + $0x80] sm:$0xff] %v209_v16 }
  0x21   : > { %212 = vst [vmem:[%s840_s29 + $0x88] sm:$0xff] %v211_v17 }
  0x22   : > { %214 = vst [vmem:[%s840_s29 + $0x90] sm:$0xff] %v213_v18 }
  0x23   : > { %216 = vst [vmem:[%s840_s29 + $0x98] sm:$0xff] %v215_v19 }
  0x24   : > { %218 = vst [vmem:[%s840_s29 + $0xa0] sm:$0xff] %v217_v20 }
  0x25   : > { %220 = vst [vmem:[%s840_s29 + $0xa8] sm:$0xff] %v219_v21 }
  0x26   : > { %222 = vst [vmem:[%s840_s29 + $0xb0] sm:$0xff] %v221_v22 }
  0x27   : > { %224 = vst [vmem:[%s840_s29 + $0xb8] sm:$0xff] %v223_v23 }
  0x28   : > { %226 = vst [vmem:[%s840_s29 + $0xc0] sm:$0xff] %v225_v24 }
  0x29   : > { %228 = vst [vmem:[%s840_s29 + $0xc8] sm:$0xff] %v227_v25 }
  0x2a   : > { %230 = vst [vmem:[%s840_s29 + $0xd0] sm:$0xff] %v229_v26 }
  0x2b   : > { %232 = vst [vmem:[%s840_s29 + $0xd8] sm:$0xff] %v231_v27 }
  0x2c   : > { %234 = vst [vmem:[%s840_s29 + $0xe0] sm:$0xff] %v233_v28 }
  0x2d   : > { %236 = vst [vmem:[%s840_s29 + $0xe8] sm:$0xff] %v235_v29 }
  0x2e   : > { %238 = vst [vmem:[%s840_s29 + $0xf0] sm:$0xff] %v237_v30 }
  0x2f   : > { %240 = vst [vmem:[%s840_s29 + $0xf8] sm:$0xff] %v239_v31 }
  0x30   : > { %242 = vst [vmem:[%s840_s29 + $0x100] sm:$0xff] %v241_v32 }
  0x31   : > { %244 = vst [vmem:[%s840_s29 + $0x108] sm:$0xff] %v243_v33 }
  0x32   : > { %246 = vst [vmem:[%s840_s29 + $0x110] sm:$0xff] %v245_v34 }
  0x33   : > { %248 = vst [vmem:[%s840_s29 + $0x118] sm:$0xff] %v247_v35 }
  0x34   : > { %250 = vst [vmem:[%s840_s29 + $0x120] sm:$0xff] %v249_v36 }
  0x35   : > { %252 = vst [vmem:[%s840_s29 + $0x128] sm:$0xff] %v251_v37 }
  0x36   : > { %254 = vst [vmem:[%s840_s29 + $0x130] sm:$0xff] %v253_v38 }
  0x37   : > { %256 = vst [vmem:[%s840_s29 + $0x138] sm:$0xff] %v255_v39 }
  0x38 PF: > { %p699_p5 = scmp.ge.s32.totalorder %s773_s17, 1  ;;  %p270_p6 = scmp.lt.s32.totalorder %s773_s17, 9 }
  0x3a   : > { %p271_p7 = pnand %p699_p5, %p270_p6 }
  0x3b   : > { %s277_s30 = sand.u32 (!%p271_p7), 1, %s765_s15   ;;  %s700_s11 = sshll.u32 (!%p271_p7), %s693_s18, 3 }
  0x3c   : > { %274 = sbr.rel (%p271_p7) target bundleno = 227 (0xe3), region = 55  ;;  %p309_p8 = scmp.lt.s32.totalorder (!%p271_p7), %s700_s11, 63 }
  0x3d   : > { %s724_s5 = smul.u32 (!%p271_p7), 320, %s277_s30 }
  0x3f   : > { %s925_s8 = scalar_lea.vmem (!%p271_p7), [#allocation2], %s724_s5 }
  0x41   : > { %v775_v40 = vmov 0   ;;  %v361_v41 = vld [vmem:[%s1010_s2] sm:$0xf]  ;;  %vm371_vm0 = vcmask 1043456   ;;  %v355_v42 = vld [vmem:[%s925_s8 + $0x110] sm:$0xf] }
  0x42   : > { %750 = vset.pattern.permute.xlu0 %v775_v40  ;;  %v356_v43 = vld [vmem:[%s925_s8 + $0x118] sm:$0xf]  ;;  %v347_v44 = vld [vmem:[%s925_s8 + $0xd0] sm:$0xff]  ;;  %708 = vmatpush.msk.msra.mxu2 %vm371_vm0, %v355_v42  ;;  %v354_v46 = vld [vmem:[%s925_s8 + $0x108] sm:$0xf]  ;;  %vm367_vm1 = vcmask 293888  }
  0x43   : > { %364 = vperm.xlu0 %750, %v361_v41   ;;  %710 = vmatpush.msk.msra.mxu3 %vm371_vm0, %v356_v43  ;;  %v348_v45 = vld [vmem:[%s925_s8 + $0xd8] sm:$0xff]  ;;  %v339_v47 = vld [vmem:[%s925_s8 + $0x90] sm:$0xff]  ;;  %v353_v49 = vld [vmem:[%s925_s8 + $0x100] sm:$0xf]  ;;  %s1017_s11 = smov (!%p309_p8, %s700_s11), 63 }
  0x44   : > { %706 = vmatpush.msk.msra.mxu1 %vm371_vm0, %v354_v46  ;;  %v340_v48 = vld [vmem:[%s925_s8 + $0x98] sm:$0xff]  ;;  %v346_v50 = vld [vmem:[%s925_s8 + $0xc8] sm:$0xff]  ;;  %448 = vmatpush.msra.mxu2 %v347_v44  ;;  %v345_v51 = vld [vmem:[%s925_s8 + $0xc0] sm:$0xff]  ;;  %s701_s12 = sshll.u32 %s1017_s11, 2 }
  0x45   : > { %468 = vmatpush.msra.mxu3 %v348_v45  ;;  %704 = vmatpush.msk.msra.mxu0 %vm371_vm0, %v353_v49  ;;  %v331_v52 = vld [vmem:[%s925_s8 + $0x50] sm:$0xff]  ;;  %v332_v53 = vld [vmem:[%s925_s8 + $0x58] sm:$0xff]  ;;  %v338_v54 = vld [vmem:[%s925_s8 + $0x88] sm:$0xff]  ;;  %s312_s15 = scalar_lea.vmem %s1011_s3, %s701_s12  ;;  %s318_s20 = scalar_lea.vmem %s1012_s4, %s701_s12 }
  0x46   : > { %428 = vmatpush.msra.mxu1 %v346_v50  ;;  %449 = vmatpush.msra.mxu2 %v339_v47  ;;  %v337_v55 = vld [vmem:[%s925_s8 + $0x80] sm:$0xff]  ;;  %v323_v56 = vld [vmem:[%s925_s8 + $0x10] sm:$0xff]  ;;  %v324_v57 = vld [vmem:[%s925_s8 + $0x18] sm:$0xff] }
  0x47   : > { %469 = vmatpush.msra.mxu3 %v340_v48  ;;  %408 = vmatpush.msra.mxu0 %v345_v51  ;;  %v330_v58 = vld [vmem:[%s925_s8 + $0x48] sm:$0xff]  ;;  %v359_v59 = vld [vmem:[%s925_s8 + $0x130] sm:$0xf]  ;;  %v360_v60 = vld [vmem:[%s925_s8 + $0x138] sm:$0xf] }
  0x48   : > { %429 = vmatpush.msra.mxu1 %v338_v54  ;;  %450 = vmatpush.msra.mxu2 %v331_v52  ;;  %v320_v61 = vld [vmem:[%s1009_s1] sm:$0xf]  ;;  %v351_v62 = vld [vmem:[%s925_s8 + $0xf0] sm:$0xff]  ;;  %v329_v0 = vld [vmem:[%s925_s8 + $0x40] sm:$0xff] }
  0x49   : > { %470 = vmatpush.msra.mxu3 %v332_v53  ;;  %409 = vmatpush.msra.mxu0 %v337_v55  ;;  %v352_v63 = vld [vmem:[%s925_s8 + $0xf8] sm:$0xff]  ;;  %v322_v1 = vld [vmem:[%s925_s8 + $0x8] sm:$0xff]  ;;  %v343_v3 = vld [vmem:[%s925_s8 + $0xb0] sm:$0xff] }
  0x4a   : > { %430 = vmatpush.msra.mxu1 %v330_v58  ;;  %451 = vmatpush.msra.mxu2 %v323_v56  ;;  %v358_v2 = vld [vmem:[%s925_s8 + $0x128] sm:$0xf]  ;;  %v344_v4 = vld [vmem:[%s925_s8 + $0xb8] sm:$0xff]  ;;  %v321_v5 = vld [vmem:[%s925_s8] sm:$0xff] }
  0x4b   : > { %471 = vmatpush.msra.mxu3 %v324_v57  ;;  %709 = vmatmul.msk.f32.vlgmr.msra.gmra.mxu2 %vm367_vm1, %v320_v61  ;;  %v357_v6 = vld [vmem:[%s925_s8 + $0x120] sm:$0xf]  ;;  %v350_v7 = vld [vmem:[%s925_s8 + $0xe8] sm:$0xff]  ;;  %v335_v8 = vld [vmem:[%s925_s8 + $0x70] sm:$0xff] }
  0x4c   : > { %716 = vmatpush.msk.msrb.mxu2 %vm371_vm0, %v359_v59  ;;  %711 = vmatmul.msk.f32.vlgmr.msra.gmra.mxu3 %vm367_vm1, %v320_v61  ;;  %v336_v9 = vld [vmem:[%s925_s8 + $0x78] sm:$0xff]  ;;  %v349_v10 = vld [vmem:[%s925_s8 + $0xe0] sm:$0xff]  ;;  %v342_v11 = vld [vmem:[%s925_s8 + $0xa8] sm:$0xff] }
  0x4d   : > { %718 = vmatpush.msk.msrb.mxu3 %vm371_vm0, %v360_v60  ;;  %410 = vmatpush.msra.mxu0 %v329_v0  ;;  %v327_v12 = vld [vmem:[%s925_s8 + $0x30] sm:$0xff]  ;;  %v328_v13 = vld [vmem:[%s925_s8 + $0x38] sm:$0xff]  ;;  %v341_v14 = vld [vmem:[%s925_s8 + $0xa0] sm:$0xff] }
  0x4e   : > { %528 = vmatpush.msrb.mxu2 %v351_v62  ;;  %431 = vmatpush.msra.mxu1 %v322_v1  ;;  %v334_v15 = vld [vmem:[%s925_s8 + $0x68] sm:$0xff]  ;;  %v333_v16 = vld [vmem:[%s925_s8 + $0x60] sm:$0xff]  ;;  %v556_v19 = vld [vmem:[%s312_s15] sm:$0xff] }
  0x4f   : > { %548 = vmatpush.msrb.mxu3 %v352_v63  ;;  %411 = vmatpush.msra.mxu0 %v321_v5  ;;  %v326_v17 = vld [vmem:[%s925_s8 + $0x28] sm:$0xff]  ;;  %v325_v18 = vld [vmem:[%s925_s8 + $0x20] sm:$0xff]  ;;  %564 = vst [vmem:[#allocation1] ss:$2 sm:$0xff] %v556_v19  ;;  %v559_v22 = vld [vmem:[%s312_s15 + $0x18] sm:$0xff] }
  0x50   : > { %714 = vmatpush.msk.msrb.mxu1 %vm371_vm0, %v358_v2  ;;  %529 = vmatpush.msrb.mxu2 %v343_v3  ;;  %v557_v20 = vld [vmem:[%s312_s15 + $0x8] sm:$0xff]  ;;  %v558_v21 = vld [vmem:[%s312_s15 + $0x10] sm:$0xff]  ;;  %570 = vst [vmem:[#allocation1 + $0x30] ss:$2 sm:$0xff] %v559_v22 }
  0x51   : > { %549 = vmatpush.msrb.mxu3 %v344_v4  ;;  %707 = vmatmul.msk.f32.vlgmr.msra.gmra.mxu1 %vm367_vm1, %v320_v61  ;;  %566 = vst [vmem:[#allocation1 + $0x10] ss:$2 sm:$0xff] %v557_v20 }
  0x52   : > { %712 = vmatpush.msk.msrb.mxu0 %vm371_vm0, %v357_v6  ;;  %508 = vmatpush.msrb.mxu1 %v350_v7  ;;  %568 = vst [vmem:[#allocation1 + $0x20] ss:$2 sm:$0xff] %v558_v21 }
  0x53   : > { %530 = vmatpush.msrb.mxu2 %v335_v8  ;;  %550 = vmatpush.msrb.mxu3 %v336_v9 }
  0x54   : > { %705 = vmatmul.msk.f32.vlgmr.msra.gmra.mxu0 %vm367_vm1, %v320_v61  ;;  %509 = vmatpush.msrb.mxu1 %v342_v11 }
  0x55   : > { %488 = vmatpush.msrb.mxu0 %v349_v10  ;;  %531 = vmatpush.msrb.mxu2 %v327_v12 }
  0x56   : > { %551 = vmatpush.msrb.mxu3 %v328_v13  ;;  %717 = vmatmul.msk.f32.vlgmr.msrb.gmra.mxu2 %vm367_vm1, %v320_v61  ;;  %v572_v25 = vld.sshfl [vmem:[#allocation1 + $0x8] sm:$0xff pattern:$0x75316420]  ;;  %v571_v32 = vld.sshfl [vmem:[#allocation1] sm:$0xff pattern:$0x75316420] }
  0x57   : > { %719 = vmatmul.msk.f32.vlgmr.msrb.gmra.mxu3 %vm367_vm1, %v320_v61  ;;  %489 = vmatpush.msrb.mxu0 %v341_v14  ;;  %v578_v53 = vld.sshfl [vmem:[#allocation1 + $0x38] sm:$0xff pattern:$0x75316420]  ;;  %v577_v58 = vld.sshfl [vmem:[#allocation1 + $0x30] sm:$0xff pattern:$0x75316420] }
  0x58   : > { %510 = vmatpush.msrb.mxu1 %v334_v15  ;;  %v573_v28 = vld.sshfl [vmem:[#allocation1 + $0x10] sm:$0xff pattern:$0x75316420]  ;;  %v574_v30 = vld.sshfl [vmem:[#allocation1 + $0x18] sm:$0xff pattern:$0x75316420] }
  0x59   : > { %490 = vmatpush.msrb.mxu0 %v333_v16  ;;  %v576_v45 = vld.sshfl [vmem:[#allocation1 + $0x28] sm:$0xff pattern:$0x75316420]  ;;  %v575_v48 = vld.sshfl [vmem:[#allocation1 + $0x20] sm:$0xff pattern:$0x75316420] }
  0x5a   : > { %511 = vmatpush.msrb.mxu1 %v326_v17 }
  0x5b   : > { %715 = vmatmul.msk.f32.vlgmr.msrb.gmra.mxu1 %vm367_vm1, %v320_v61  ;;  %491 = vmatpush.msrb.mxu0 %v325_v18 }
  0x5c   : > { %713 = vmatmul.msk.f32.vlgmr.msrb.gmra.mxu0 %vm367_vm1, %v320_v61 }
  0xb5   : > { %v365_v23 = vpop.permute.xlu0 %364 }
  0xce   : > { %v433_v24 = vpop.f32.mrf.mxu1  ;;  %v453_v27 = vpop.f32.mrf.mxu2 }
  0xcf   : > { %v434_v26 = vadd.f32 %v433_v24, %v365_v23  ;;  %v473_v29 = vpop.f32.mrf.mxu3  ;;  %v454_v33 = vadd.f32 %v453_v27, %v365_v23 }
  0xd0   : > { %v474_v34 = vadd.f32 %v473_v29, %v365_v23 }
  0xd1   : > { %v413_v31 = vpop.f32.mrf.mxu0  ;;  %v588_v36 = vadd.f32 %v572_v25, %v434_v26  ;;  %v589_v37 = vadd.f32 %v573_v28, %v454_v33 }
  0xd2   : > { %v414_v35 = vadd.f32 %v413_v31, %v365_v23  ;;  %v590_v38 = vadd.f32 %v574_v30, %v474_v34 }
  0xd3   : > { %v603_v40 = vrot.slane %v588_v36, 4 }
  0xd4   : > { %v587_v39 = vadd.f32 %v571_v32, %v414_v35  ;;  %v604_v41 = vrot.slane %v590_v38, 4 }
  0xd6   : > { %v607_v42 = vsel %vm371_vm0, %v587_v39, %v603_v40  ;;  %v608_v43 = vsel %vm371_vm0, %v589_v37, %v604_v41 }
  0xd7   : > { %615 = vst [vmem:[%s318_s20] sm:$0xff] %v607_v42 }
  0xd8   : > { %616 = vst [vmem:[%s318_s20 + $0x8] sm:$0xff] %v608_v43  ;;  %v513_v44 = vpop.f32.mrf.mxu1 }
  0xd9   : > { %v514_v46 = vadd.f32 %v513_v44, %v365_v23  ;;  %v493_v47 = vpop.f32.mrf.mxu0  ;;  %v533_v49 = vpop.f32.mrf.mxu2 }
  0xda   : > { %v494_v51 = vadd.f32 %v493_v47, %v365_v23  ;;  %v553_v52 = vpop.f32.mrf.mxu3  ;;  %v534_v54 = vadd.f32 %v533_v49, %v365_v23 }
  0xdb   : > { %v592_v50 = vadd.f32 %v576_v45, %v514_v46  ;;  %v554_v55 = vadd.f32 %v553_v52, %v365_v23 }
  0xdc   : > { %v591_v57 = vadd.f32 %v575_v48, %v494_v51  ;;  %v593_v61 = vadd.f32 %v577_v58, %v534_v54 }
  0xdd   : > { %v605_v56 = vrot.slane %v592_v50, 4  ;;  %v594_v59 = vadd.f32 %v578_v53, %v554_v55 }
  0xdf   : > { %v609_v60 = vsel %vm371_vm0, %v591_v57, %v605_v56  ;;  %v606_v62 = vrot.slane %v594_v59, 4 }
  0xe0   : > { %617 = vst [vmem:[%s318_s20 + $0x10] sm:$0xff] %v609_v60 }
  0xe1   : > { %v610_v63 = vsel %vm371_vm0, %v593_v61, %v606_v62 }
  0xe2   : > { %618 = vst [vmem:[%s318_s20 + $0x18] sm:$0xff] %v610_v63 }
  0xe3 PF: > { %p11_p9 = scmp.ge.s32.totalorder %s818_s19, 10   ;;  %s1013_s15 = smov %s769_s16 }
  0xe4   : > { %s1014_s16 = smov %s827_s22  ;;  %s1015_s17 = smov %s818_s19 }
  0xe5   :  { %13 = sbr.rel (!%p11_p9) target bundleno = 2 (0x2), region = 100 }

</bundles_post_ra>
